<compile_context>
chip_gen: v5e
topology: v5e:2x2
jax: 0.10.0
libtpu: 0.0.40
codegen_flags: <defaults>
</compile_context>

<pallas_src>
import jax
import jax.numpy as jnp
from jax.experimental import pallas as pl
from jax.experimental.pallas import tpu as pltpu


def _scale_mul_kernel(scale_ref, x_ref, o_ref):
    # scale_ref: (nc, 1), x_ref: (nc, HW) -> lane-broadcast multiply on the VPU.
    o_ref[...] = scale_ref[...] * x_ref[...]


def _round_up(x, m):
    return ((x + m - 1) // m) * m


# Whole-array-in-VMEM only while comfortably under every generation's scoped
# VMEM default (v7x: 32 MiB scoped / 64 MiB physical).
_SMALL_TOTAL_BYTES = 8 << 20
# Per-block budget for the tiled path (~2 MiB x double-buffered in+out ≈ 8 MiB
# resident), safe on all generations.
_TILE_BLOCK_BYTES = 2 << 20
_SUBLANE = 8  # f32 sublane pack; bf16 blocks are still legal at 8-row multiples


def channel_scale_mul(x228, x223):
    """x228: (N, C, 1, 1), x223: (N, C, H, W) -> x228 * x223, shape of x223."""
    N, C, H, W = x223.shape
    assert x228.shape == (N, C, 1, 1)

    NC, HW = N * C, H * W
    x2d = x223.reshape(NC, HW)   # contiguous NCHW -> free reshape
    s2d = x228.reshape(NC, 1)

    itemsize = jnp.dtype(x223.dtype).itemsize
    total_bytes = (2 * NC * HW + NC) * itemsize
    cost = pl.CostEstimate(
        flops=NC * HW,
        transcendentals=0,
        bytes_accessed=total_bytes,
    )

    if total_bytes <= _SMALL_TOTAL_BYTES:
        # Grid-less: single VMEM block per array, no per-step bookkeeping.
        out2d = pl.pallas_call(
            _scale_mul_kernel,
            out_shape=jax.ShapeDtypeStruct((NC, HW), x223.dtype),
            in_specs=[
                pl.BlockSpec(memory_space=pltpu.MemorySpace.VMEM),
                pl.BlockSpec(memory_space=pltpu.MemorySpace.VMEM),
            ],
            out_specs=pl.BlockSpec(memory_space=pltpu.MemorySpace.VMEM),
            # Output aliases the feature-map input (elementwise, in-place safe).
            input_output_aliases={1: 0},
            cost_estimate=cost,
        )(s2d, x2d)
    else:
        # Tiled fallback: chunk the NC (sublane) axis, keep full HW rows.
        row_bytes = max(HW * itemsize, 1)
        tile_nc = max(_SUBLANE, (_TILE_BLOCK_BYTES // row_bytes) // _SUBLANE * _SUBLANE)
        tile_nc = min(tile_nc, _round_up(NC, _SUBLANE))
        grid = (pl.cdiv(NC, tile_nc),)

        out2d = pl.pallas_call(
            _scale_mul_kernel,
            out_shape=jax.ShapeDtypeStruct((NC, HW), x223.dtype),
            grid=grid,
            in_specs=[
                pl.BlockSpec((tile_nc, 1), lambda i: (i, 0)),
                pl.BlockSpec((tile_nc, HW), lambda i: (i, 0)),
            ],
            out_specs=pl.BlockSpec((tile_nc, HW), lambda i: (i, 0)),
            input_output_aliases={1: 0},
            cost_estimate=cost,
            compiler_params=pltpu.CompilerParams(
                # Pure loop on v5e/v6e; shards across v7x's 2 TensorCores.
                dimension_semantics=("parallel",),
            ),
        )(s2d, x2d)

    return out2d.reshape(N, C, H, W)


if __name__ == "__main__":
    key = jax.random.PRNGKey(0)
    k1, k2, k3, k4, k5, k6 = jax.random.split(key, 6)

    # Shapes implied by the module's forward (small, grid-less path).
    x223 = jax.random.normal(k1, (1, 336, 14, 14), dtype=jnp.float32)
    x228 = jax.random.normal(k2, (1, 336, 1, 1), dtype=jnp.float32)
    ref = x228 * x223                      # reference computed before the call
    out = channel_scale_mul(x228, x223)
    jax.block_until_ready(out)
    assert out.shape == (1, 336, 14, 14)
    assert jnp.allclose(out, ref, atol=1e-6, rtol=1e-6)

    # Batch > 1 (folded into the channel axis), still small path.
    xb = jax.random.normal(k3, (2, 64, 7, 7), dtype=jnp.float32)
    sb = jax.random.normal(k4, (2, 64, 1, 1), dtype=jnp.float32)
    refb = sb * xb
    outb = channel_scale_mul(sb, xb)
    jax.block_until_ready(outb)
    assert jnp.allclose(outb, refb, atol=1e-6, rtol=1e-6)

    # Larger shape exercises the tiled, VMEM-safe, megacore-parallel path.
    xl = jax.random.normal(k5, (4, 128, 64, 64), dtype=jnp.float32)
    sl = jax.random.normal(k6, (4, 128, 1, 1), dtype=jnp.float32)
    refl = sl * xl
    outl = channel_scale_mul(sl, xl)
    jax.block_until_ready(outl)
    assert jnp.allclose(outl, refl, atol=1e-6, rtol=1e-6)

    print("KERNEL_OK")
</pallas_src>

<mosaic_0001>
module attributes {stable_mosaic.version = 11 : i64} {
  func.func @_scale_mul_kernel(%arg0: memref<336x1xf32, #tpu.memory_space<vmem>>, %arg1: memref<336x196xf32, #tpu.memory_space<vmem>>, %arg2: memref<336x196xf32, #tpu.memory_space<vmem>>) attributes {dimension_semantics = [], scalar_prefetch = 0 : i64, scratch_operands = 0 : i64, tpu.core_type = #tpu.core_type<tc>} {
    %c0 = arith.constant 0 : index
    %c0_0 = arith.constant 0 : index
    %0 = vector.load %arg0[%c0, %c0_0] : memref<336x1xf32, #tpu.memory_space<vmem>>, vector<336x1xf32>
    %c0_1 = arith.constant 0 : index
    %c0_2 = arith.constant 0 : index
    %1 = vector.load %arg1[%c0_1, %c0_2] : memref<336x196xf32, #tpu.memory_space<vmem>>, vector<336x196xf32>
    %2 = vector.broadcast %0 : vector<336x1xf32> to vector<336x196xf32>
    %3 = arith.mulf %2, %1 : vector<336x196xf32>
    %c0_3 = arith.constant 0 : index
    %c0_4 = arith.constant 0 : index
    %4 = vector.load %arg2[%c0_3, %c0_4] : memref<336x196xf32, #tpu.memory_space<vmem>>, vector<336x196xf32>
    tpu.vector_store %arg2[%c0_3, %c0_4], %3 {strides = array<i32>} : memref<336x196xf32, #tpu.memory_space<vmem>>, vector<336x196xf32>,
    return
  }
}

</mosaic_0001>

<bundles_post_ra>
// kernel: tpu_custom_call.1
= control target key start
LH: loop header
LB: loop body
LE: loop exit
PB: predicated region body
PF: predicated region fallthrough
CT: control target
= control target key end

     0   :  { %v524_v0 = vmov 0   ;;  %vm432_vm0 = vcmask 556032   ;;  %s1212_s0 = inlined_call_operand.vmem [shape: f32[336,1], index: 0, kind: input, shape index: {}]   ;;  %s1213_s1 = inlined_call_operand.vmem [shape: f32[336,196], index: 1, kind: input, shape index: {}, may-alias: {1,2}]   ;;  %s1214_s2 = inlined_call_operand.vmem [shape: f32[336,196], index: 2, kind: output, shape index: {}, may-alias: {1,2}]  }
   0x1   :  { %523 = vset.pattern.permute.xlu2 %v524_v0  ;;  %522 = vset.pattern.permute.xlu1 %v524_v0  ;;  %v15_v1 = vld [vmem:[%s1212_s0 + $0x20] sm:$0xff]  ;;  %v13_v2 = vld [vmem:[%s1212_s0 + $0x10] sm:$0xff]  ;;  %v16_v4 = vld [vmem:[%s1212_s0 + $0x28] sm:$0xff] }
   0x2   :  { %v11_v3 = vld [vmem:[%s1212_s0] sm:$0xff]  ;;  %521 = vset.pattern.permute.xlu0 %v524_v0  ;;  %159 = vperm.xlu2 %523, %v15_v1   ;;  %v14_v5 = vld [vmem:[%s1212_s0 + $0x18] sm:$0xff]  ;;  %v12_v6 = vld [vmem:[%s1212_s0 + $0x8] sm:$0xff] }
   0x3   :  { %149 = vperm.xlu1 %522, %v13_v2   ;;  %139 = vperm.xlu0 %521, %v11_v3   ;;  %v19_v7 = vld [vmem:[%s1212_s0 + $0x40] sm:$0xff]  ;;  %v18_v8 = vld [vmem:[%s1212_s0 + $0x38] sm:$0xff]  ;;  %v17_v9 = vld [vmem:[%s1212_s0 + $0x30] sm:$0xff] }
   0x4   :  { %v22_v10 = vld [vmem:[%s1212_s0 + $0x58] sm:$0xff]  ;;  %v21_v11 = vld [vmem:[%s1212_s0 + $0x50] sm:$0xff]  ;;  %v20_v12 = vld [vmem:[%s1212_s0 + $0x48] sm:$0xff] }
   0x5   :  { %v25_v13 = vld [vmem:[%s1212_s0 + $0x70] sm:$0xff]  ;;  %v24_v14 = vld [vmem:[%s1212_s0 + $0x68] sm:$0xff]  ;;  %v23_v15 = vld [vmem:[%s1212_s0 + $0x60] sm:$0xff] }
   0x6   :  { %v28_v16 = vld [vmem:[%s1212_s0 + $0x88] sm:$0xff]  ;;  %v27_v17 = vld [vmem:[%s1212_s0 + $0x80] sm:$0xff]  ;;  %v26_v18 = vld [vmem:[%s1212_s0 + $0x78] sm:$0xff] }
   0x7   :  { %v31_v19 = vld [vmem:[%s1212_s0 + $0xa0] sm:$0xff]  ;;  %v30_v20 = vld [vmem:[%s1212_s0 + $0x98] sm:$0xff]  ;;  %v29_v21 = vld [vmem:[%s1212_s0 + $0x90] sm:$0xff] }
   0x8   :  { %v34_v22 = vld [vmem:[%s1212_s0 + $0xb8] sm:$0xff]  ;;  %v33_v23 = vld [vmem:[%s1212_s0 + $0xb0] sm:$0xff]  ;;  %v32_v24 = vld [vmem:[%s1212_s0 + $0xa8] sm:$0xff] }
   0x9   :  { %v37_v25 = vld [vmem:[%s1212_s0 + $0xd0] sm:$0xff]  ;;  %v36_v26 = vld [vmem:[%s1212_s0 + $0xc8] sm:$0xff]  ;;  %v35_v27 = vld [vmem:[%s1212_s0 + $0xc0] sm:$0xff] }
   0xa   :  { %164 = vperm.xlu2 %523, %v16_v4   ;;  %v40_v28 = vld [vmem:[%s1212_s0 + $0xe8] sm:$0xff]  ;;  %v39_v29 = vld [vmem:[%s1212_s0 + $0xe0] sm:$0xff]  ;;  %v38_v30 = vld [vmem:[%s1212_s0 + $0xd8] sm:$0xff] }
   0xb   :  { %154 = vperm.xlu1 %522, %v14_v5   ;;  %144 = vperm.xlu0 %521, %v12_v6   ;;  %v43_v31 = vld [vmem:[%s1212_s0 + $0x100] sm:$0xff]  ;;  %v42_v32 = vld [vmem:[%s1212_s0 + $0xf8] sm:$0xff]  ;;  %v41_v33 = vld [vmem:[%s1212_s0 + $0xf0] sm:$0xff] }
   0xc   :  { %v46_v34 = vld [vmem:[%s1212_s0 + $0x118] sm:$0xff]  ;;  %v45_v35 = vld [vmem:[%s1212_s0 + $0x110] sm:$0xff]  ;;  %v44_v36 = vld [vmem:[%s1212_s0 + $0x108] sm:$0xff] }
   0xd   :  { %v61_v37 = vld [vmem:[%s1213_s1 + $0x40] sm:$0xff]  ;;  %v62_v38 = vld [vmem:[%s1213_s1 + $0x48] sm:$0xff]  ;;  %v49_v42 = vld [vmem:[%s1212_s0 + $0x130] sm:$0xff] }
   0xe   :  { %v48_v43 = vld [vmem:[%s1212_s0 + $0x128] sm:$0xff]  ;;  %v47_v44 = vld [vmem:[%s1212_s0 + $0x120] sm:$0xff]  ;;  %v50_v52 = vld [vmem:[%s1212_s0 + $0x138] sm:$0xff] }
   0xf   :  { %v52_v50 = vld [vmem:[%s1212_s0 + $0x148] sm:$0xff]  ;;  %v51_v51 = vld [vmem:[%s1212_s0 + $0x140] sm:$0xff] }
  0x12   :  { %179 = vperm.xlu2 %523, %v19_v7  }
  0x13   :  { %174 = vperm.xlu1 %522, %v18_v8   ;;  %169 = vperm.xlu0 %521, %v17_v9  }
  0x1a   :  { %194 = vperm.xlu2 %523, %v22_v10  }
  0x1b   :  { %189 = vperm.xlu1 %522, %v21_v11   ;;  %184 = vperm.xlu0 %521, %v20_v12  }
  0x22   :  { %209 = vperm.xlu2 %523, %v25_v13  }
  0x23   :  { %204 = vperm.xlu1 %522, %v24_v14   ;;  %199 = vperm.xlu0 %521, %v23_v15  }
  0x2a   :  { %224 = vperm.xlu2 %523, %v28_v16  }
  0x2b   :  { %219 = vperm.xlu1 %522, %v27_v17   ;;  %214 = vperm.xlu0 %521, %v26_v18  }
  0x32   :  { %239 = vperm.xlu2 %523, %v31_v19  }
  0x33   :  { %234 = vperm.xlu1 %522, %v30_v20   ;;  %229 = vperm.xlu0 %521, %v29_v21  }
  0x3a   :  { %254 = vperm.xlu2 %523, %v34_v22  }
  0x3b   :  { %249 = vperm.xlu1 %522, %v33_v23   ;;  %244 = vperm.xlu0 %521, %v32_v24  }
  0x42   :  { %269 = vperm.xlu2 %523, %v37_v25  }
  0x43   :  { %264 = vperm.xlu1 %522, %v36_v26   ;;  %259 = vperm.xlu0 %521, %v35_v27  }
  0x4a   :  { %284 = vperm.xlu2 %523, %v40_v28  }
  0x4b   :  { %279 = vperm.xlu1 %522, %v39_v29   ;;  %274 = vperm.xlu0 %521, %v38_v30  }
  0x52   :  { %299 = vperm.xlu2 %523, %v43_v31  }
  0x53   :  { %294 = vperm.xlu1 %522, %v42_v32   ;;  %289 = vperm.xlu0 %521, %v41_v33  }
  0x5a   :  { %314 = vperm.xlu2 %523, %v46_v34  }
  0x5b   :  { %309 = vperm.xlu1 %522, %v45_v35   ;;  %304 = vperm.xlu0 %521, %v44_v36  }
  0x5c   :  { %v160_v39 = vpop.permute.xlu2 %159 }
  0x5d   :  { %v355_v40 = vmul.f32 %v160_v39, %v61_v37  ;;  %v356_v41 = vmul.f32 %v160_v39, %v62_v38 }
  0x5f   :  { %440 = vst [vmem:[%s1214_s2 + $0x40] sm:$0xff] %v355_v40 }
  0x60   :  { %441 = vst.msk [vmem:[%s1214_s2 + $0x48] sm:$0xff] %vm432_vm0, %v356_v41 }
  0x62   :  { %329 = vperm.xlu2 %523, %v49_v42  }
  0x63   :  { %324 = vperm.xlu1 %522, %v48_v43   ;;  %319 = vperm.xlu0 %521, %v47_v44  }
  0x64   :  { %v165_v47 = vpop.permute.xlu2 %164 }
  0x67   :  { %v63_v45 = vld [vmem:[%s1213_s1 + $0x50] sm:$0xff]  ;;  %v64_v46 = vld [vmem:[%s1213_s1 + $0x58] sm:$0xff] }
  0x68   :  { %v357_v48 = vmul.f32 %v165_v47, %v63_v45  ;;  %v358_v49 = vmul.f32 %v165_v47, %v64_v46 }
  0x6a   :  { %442 = vst [vmem:[%s1214_s2 + $0x50] sm:$0xff] %v357_v48  ;;  %344 = vperm.xlu2 %523, %v52_v50  }
  0x6b   :  { %443 = vst.msk [vmem:[%s1214_s2 + $0x58] sm:$0xff] %vm432_vm0, %v358_v49  ;;  %339 = vperm.xlu1 %522, %v51_v51   ;;  %334 = vperm.xlu0 %521, %v50_v52  }
  0x6c   :  { %v180_v55 = vpop.permute.xlu2 %179 }
  0x72   :  { %v69_v53 = vld [vmem:[%s1213_s1 + $0x80] sm:$0xff]  ;;  %v70_v54 = vld [vmem:[%s1213_s1 + $0x88] sm:$0xff] }
  0x73   :  { %v363_v56 = vmul.f32 %v180_v55, %v69_v53  ;;  %v364_v57 = vmul.f32 %v180_v55, %v70_v54 }
  0x74   :  { %v195_v62 = vpop.permute.xlu2 %194 }
  0x75   :  { %448 = vst [vmem:[%s1214_s2 + $0x80] sm:$0xff] %v363_v56  ;;  %v150_v2 = vpop.permute.xlu1 %149  ;;  %v140_v4 = vpop.permute.xlu0 %139 }
  0x76   :  { %449 = vst.msk [vmem:[%s1214_s2 + $0x88] sm:$0xff] %vm432_vm0, %v364_v57 }
  0x7c   :  { %v210_v13 = vpop.permute.xlu2 %209 }
  0x7d   :  { %v75_v58 = vld [vmem:[%s1213_s1 + $0xb0] sm:$0xff]  ;;  %v76_v59 = vld [vmem:[%s1213_s1 + $0xb8] sm:$0xff]  ;;  %v57_v60 = vld [vmem:[%s1213_s1 + $0x20] sm:$0xff]  ;;  %v155_v17 = vpop.permute.xlu1 %154  ;;  %v145_v19 = vpop.permute.xlu0 %144 }
  0x7e   :  { %v58_v61 = vld [vmem:[%s1213_s1 + $0x28] sm:$0xff]  ;;  %v53_v63 = vld [vmem:[%s1213_s1] sm:$0xff]  ;;  %v369_v0 = vmul.f32 %v195_v62, %v75_v58  ;;  %v370_v1 = vmul.f32 %v195_v62, %v76_v59  ;;  %v351_v5 = vmul.f32 %v150_v2, %v57_v60 }
  0x7f   :  { %v54_v3 = vld [vmem:[%s1213_s1 + $0x8] sm:$0xff]  ;;  %v352_v6 = vmul.f32 %v150_v2, %v58_v61  ;;  %v347_v7 = vmul.f32 %v140_v4, %v53_v63 }
  0x80   :  { %454 = vst [vmem:[%s1214_s2 + $0xb0] sm:$0xff] %v369_v0  ;;  %v348_v8 = vmul.f32 %v140_v4, %v54_v3 }
  0x81   :  { %455 = vst.msk [vmem:[%s1214_s2 + $0xb8] sm:$0xff] %vm432_vm0, %v370_v1 }
  0x82   :  { %436 = vst [vmem:[%s1214_s2 + $0x20] sm:$0xff] %v351_v5 }
  0x83   :  { %437 = vst.msk [vmem:[%s1214_s2 + $0x28] sm:$0xff] %vm432_vm0, %v352_v6 }
  0x84   :  { %v225_v28 = vpop.permute.xlu2 %224 }
  0x85   :  { %v175_v32 = vpop.permute.xlu1 %174  ;;  %v170_v34 = vpop.permute.xlu0 %169 }
  0x8a   :  { %v81_v9 = vld [vmem:[%s1213_s1 + $0xe0] sm:$0xff]  ;;  %v82_v10 = vld [vmem:[%s1213_s1 + $0xe8] sm:$0xff] }
  0x8b   :  { %431 = vst [vmem:[%s1214_s2] sm:$0xff] %v347_v7  ;;  %v375_v15 = vmul.f32 %v210_v13, %v81_v9  ;;  %v376_v16 = vmul.f32 %v210_v13, %v82_v10 }
  0x8c   :  { %v240_v43 = vpop.permute.xlu2 %239 }
  0x8d   :  { %v190_v47 = vpop.permute.xlu1 %189  ;;  %v185_v49 = vpop.permute.xlu0 %184 }
  0x92   :  { %v59_v11 = vld [vmem:[%s1213_s1 + $0x30] sm:$0xff]  ;;  %v60_v12 = vld [vmem:[%s1213_s1 + $0x38] sm:$0xff] }
  0x93   :  { %433 = vst.msk [vmem:[%s1214_s2 + $0x8] sm:$0xff] %vm432_vm0, %v348_v8  ;;  %v353_v20 = vmul.f32 %v155_v17, %v59_v11  ;;  %v354_v21 = vmul.f32 %v155_v17, %v60_v12 }
  0x94   :  { %v255_v58 = vpop.permute.xlu2 %254 }
  0x95   :  { %v205_v62 = vpop.permute.xlu1 %204  ;;  %v200_v0 = vpop.permute.xlu0 %199 }
  0x9a   :  { %v55_v14 = vld [vmem:[%s1213_s1 + $0x10] sm:$0xff]  ;;  %v56_v18 = vld [vmem:[%s1213_s1 + $0x18] sm:$0xff] }
  0x9b   :  { %460 = vst [vmem:[%s1214_s2 + $0xe0] sm:$0xff] %v375_v15  ;;  %v349_v22 = vmul.f32 %v145_v19, %v55_v14  ;;  %v350_v23 = vmul.f32 %v145_v19, %v56_v18 }
  0x9c   :  { %461 = vst.msk [vmem:[%s1214_s2 + $0xe8] sm:$0xff] %vm432_vm0, %v376_v16  ;;  %v270_v9 = vpop.permute.xlu2 %269 }
  0x9d   :  { %438 = vst [vmem:[%s1214_s2 + $0x30] sm:$0xff] %v353_v20  ;;  %v220_v13 = vpop.permute.xlu1 %219  ;;  %v215_v15 = vpop.permute.xlu0 %214 }
  0x9e   :  { %439 = vst.msk [vmem:[%s1214_s2 + $0x38] sm:$0xff] %vm432_vm0, %v354_v21 }
  0xa5   :  { %v87_v24 = vld [vmem:[%s1213_s1 + $0x110] sm:$0xff]  ;;  %v88_v25 = vld [vmem:[%s1213_s1 + $0x118] sm:$0xff] }
  0xa6   :  { %434 = vst [vmem:[%s1214_s2 + $0x10] sm:$0xff] %v349_v22  ;;  %v381_v30 = vmul.f32 %v225_v28, %v87_v24  ;;  %v382_v31 = vmul.f32 %v225_v28, %v88_v25  ;;  %v285_v24 = vpop.permute.xlu2 %284  ;;  %v235_v28 = vpop.permute.xlu1 %234 }
  0xad   :  { %v67_v26 = vld [vmem:[%s1213_s1 + $0x70] sm:$0xff]  ;;  %v68_v27 = vld [vmem:[%s1213_s1 + $0x78] sm:$0xff] }
  0xae   :  { %435 = vst.msk [vmem:[%s1214_s2 + $0x18] sm:$0xff] %vm432_vm0, %v350_v23  ;;  %v361_v35 = vmul.f32 %v175_v32, %v67_v26  ;;  %v362_v36 = vmul.f32 %v175_v32, %v68_v27 }
  0xb5   :  { %v65_v29 = vld [vmem:[%s1213_s1 + $0x60] sm:$0xff]  ;;  %v66_v33 = vld [vmem:[%s1213_s1 + $0x68] sm:$0xff] }
  0xb6   :  { %466 = vst [vmem:[%s1214_s2 + $0x110] sm:$0xff] %v381_v30  ;;  %v359_v37 = vmul.f32 %v170_v34, %v65_v29  ;;  %v360_v38 = vmul.f32 %v170_v34, %v66_v33  ;;  %v230_v30 = vpop.permute.xlu0 %229 }
  0xb7   :  { %467 = vst.msk [vmem:[%s1214_s2 + $0x118] sm:$0xff] %vm432_vm0, %v382_v31 }
  0xb8   :  { %446 = vst [vmem:[%s1214_s2 + $0x70] sm:$0xff] %v361_v35 }
  0xb9   :  { %447 = vst.msk [vmem:[%s1214_s2 + $0x78] sm:$0xff] %vm432_vm0, %v362_v36 }
  0xc0   :  { %v93_v39 = vld [vmem:[%s1213_s1 + $0x140] sm:$0xff]  ;;  %v94_v40 = vld [vmem:[%s1213_s1 + $0x148] sm:$0xff] }
  0xc1   :  { %444 = vst [vmem:[%s1214_s2 + $0x60] sm:$0xff] %v359_v37  ;;  %v387_v45 = vmul.f32 %v240_v43, %v93_v39  ;;  %v388_v46 = vmul.f32 %v240_v43, %v94_v40  ;;  %v300_v39 = vpop.permute.xlu2 %299  ;;  %v250_v43 = vpop.permute.xlu1 %249 }
  0xc8   :  { %v73_v41 = vld [vmem:[%s1213_s1 + $0xa0] sm:$0xff]  ;;  %v74_v42 = vld [vmem:[%s1213_s1 + $0xa8] sm:$0xff] }
  0xc9   :  { %445 = vst.msk [vmem:[%s1214_s2 + $0x68] sm:$0xff] %vm432_vm0, %v360_v38  ;;  %v367_v50 = vmul.f32 %v190_v47, %v73_v41  ;;  %v368_v51 = vmul.f32 %v190_v47, %v74_v42 }
  0xd0   :  { %v71_v44 = vld [vmem:[%s1213_s1 + $0x90] sm:$0xff]  ;;  %v72_v48 = vld [vmem:[%s1213_s1 + $0x98] sm:$0xff] }
  0xd1   :  { %472 = vst [vmem:[%s1214_s2 + $0x140] sm:$0xff] %v387_v45  ;;  %v365_v52 = vmul.f32 %v185_v49, %v71_v44  ;;  %v366_v53 = vmul.f32 %v185_v49, %v72_v48  ;;  %v245_v45 = vpop.permute.xlu0 %244 }
  0xd2   :  { %473 = vst.msk [vmem:[%s1214_s2 + $0x148] sm:$0xff] %vm432_vm0, %v388_v46 }
  0xd3   :  { %452 = vst [vmem:[%s1214_s2 + $0xa0] sm:$0xff] %v367_v50 }
  0xd4   :  { %453 = vst.msk [vmem:[%s1214_s2 + $0xa8] sm:$0xff] %vm432_vm0, %v368_v51 }
  0xdb   :  { %v99_v54 = vld [vmem:[%s1213_s1 + $0x170] sm:$0xff]  ;;  %v100_v55 = vld [vmem:[%s1213_s1 + $0x178] sm:$0xff] }
  0xdc   :  { %450 = vst [vmem:[%s1214_s2 + $0x90] sm:$0xff] %v365_v52  ;;  %v393_v60 = vmul.f32 %v255_v58, %v99_v54  ;;  %v394_v61 = vmul.f32 %v255_v58, %v100_v55  ;;  %v315_v54 = vpop.permute.xlu2 %314  ;;  %v265_v58 = vpop.permute.xlu1 %264 }
  0xe3   :  { %v79_v56 = vld [vmem:[%s1213_s1 + $0xd0] sm:$0xff]  ;;  %v80_v57 = vld [vmem:[%s1213_s1 + $0xd8] sm:$0xff] }
  0xe4   :  { %451 = vst.msk [vmem:[%s1214_s2 + $0x98] sm:$0xff] %vm432_vm0, %v366_v53  ;;  %v373_v1 = vmul.f32 %v205_v62, %v79_v56  ;;  %v374_v2 = vmul.f32 %v205_v62, %v80_v57 }
  0xeb   :  { %v77_v59 = vld [vmem:[%s1213_s1 + $0xc0] sm:$0xff]  ;;  %v78_v63 = vld [vmem:[%s1213_s1 + $0xc8] sm:$0xff] }
  0xec   :  { %478 = vst [vmem:[%s1214_s2 + $0x170] sm:$0xff] %v393_v60  ;;  %v371_v3 = vmul.f32 %v200_v0, %v77_v59  ;;  %v372_v4 = vmul.f32 %v200_v0, %v78_v63  ;;  %v260_v60 = vpop.permute.xlu0 %259 }
  0xed   :  { %479 = vst.msk [vmem:[%s1214_s2 + $0x178] sm:$0xff] %vm432_vm0, %v394_v61 }
  0xee   :  { %458 = vst [vmem:[%s1214_s2 + $0xd0] sm:$0xff] %v373_v1 }
  0xef   :  { %459 = vst.msk [vmem:[%s1214_s2 + $0xd8] sm:$0xff] %vm432_vm0, %v374_v2 }
  0xf6   :  { %v105_v5 = vld [vmem:[%s1213_s1 + $0x1a0] sm:$0xff]  ;;  %v106_v6 = vld [vmem:[%s1213_s1 + $0x1a8] sm:$0xff] }
  0xf7   :  { %456 = vst [vmem:[%s1214_s2 + $0xc0] sm:$0xff] %v371_v3  ;;  %v399_v11 = vmul.f32 %v270_v9, %v105_v5  ;;  %v400_v12 = vmul.f32 %v270_v9, %v106_v6  ;;  %v330_v5 = vpop.permute.xlu2 %329  ;;  %v280_v9 = vpop.permute.xlu1 %279 }
  0xfe   :  { %v85_v7 = vld [vmem:[%s1213_s1 + $0x100] sm:$0xff]  ;;  %v86_v8 = vld [vmem:[%s1213_s1 + $0x108] sm:$0xff] }
  0xff   :  { %457 = vst.msk [vmem:[%s1214_s2 + $0xc8] sm:$0xff] %vm432_vm0, %v372_v4  ;;  %v379_v16 = vmul.f32 %v220_v13, %v85_v7  ;;  %v380_v17 = vmul.f32 %v220_v13, %v86_v8 }
 0x106   :  { %v83_v10 = vld [vmem:[%s1213_s1 + $0xf0] sm:$0xff]  ;;  %v84_v14 = vld [vmem:[%s1213_s1 + $0xf8] sm:$0xff] }
 0x107   :  { %484 = vst [vmem:[%s1214_s2 + $0x1a0] sm:$0xff] %v399_v11  ;;  %v377_v18 = vmul.f32 %v215_v15, %v83_v10  ;;  %v378_v19 = vmul.f32 %v215_v15, %v84_v14  ;;  %v275_v11 = vpop.permute.xlu0 %274 }
 0x108   :  { %485 = vst.msk [vmem:[%s1214_s2 + $0x1a8] sm:$0xff] %vm432_vm0, %v400_v12 }
 0x109   :  { %464 = vst [vmem:[%s1214_s2 + $0x100] sm:$0xff] %v379_v16 }
 0x10a   :  { %465 = vst.msk [vmem:[%s1214_s2 + $0x108] sm:$0xff] %vm432_vm0, %v380_v17 }
 0x111   :  { %v111_v20 = vld [vmem:[%s1213_s1 + $0x1d0] sm:$0xff]  ;;  %v112_v21 = vld [vmem:[%s1213_s1 + $0x1d8] sm:$0xff] }
 0x112   :  { %462 = vst [vmem:[%s1214_s2 + $0xf0] sm:$0xff] %v377_v18  ;;  %v405_v26 = vmul.f32 %v285_v24, %v111_v20  ;;  %v406_v27 = vmul.f32 %v285_v24, %v112_v21  ;;  %v345_v20 = vpop.permute.xlu2 %344  ;;  %v295_v24 = vpop.permute.xlu1 %294 }
 0x119   :  { %v91_v22 = vld [vmem:[%s1213_s1 + $0x130] sm:$0xff]  ;;  %v92_v23 = vld [vmem:[%s1213_s1 + $0x138] sm:$0xff] }
 0x11a   :  { %463 = vst.msk [vmem:[%s1214_s2 + $0xf8] sm:$0xff] %vm432_vm0, %v378_v19  ;;  %v385_v31 = vmul.f32 %v235_v28, %v91_v22  ;;  %v386_v32 = vmul.f32 %v235_v28, %v92_v23 }
 0x121   :  { %v89_v25 = vld [vmem:[%s1213_s1 + $0x120] sm:$0xff]  ;;  %v90_v29 = vld [vmem:[%s1213_s1 + $0x128] sm:$0xff] }
 0x122   :  { %490 = vst [vmem:[%s1214_s2 + $0x1d0] sm:$0xff] %v405_v26  ;;  %v383_v33 = vmul.f32 %v230_v30, %v89_v25  ;;  %v384_v34 = vmul.f32 %v230_v30, %v90_v29  ;;  %v290_v26 = vpop.permute.xlu0 %289 }
 0x123   :  { %491 = vst.msk [vmem:[%s1214_s2 + $0x1d8] sm:$0xff] %vm432_vm0, %v406_v27 }
 0x124   :  { %470 = vst [vmem:[%s1214_s2 + $0x130] sm:$0xff] %v385_v31 }
 0x125   :  { %471 = vst.msk [vmem:[%s1214_s2 + $0x138] sm:$0xff] %vm432_vm0, %v386_v32 }
 0x12c   :  { %v117_v35 = vld [vmem:[%s1213_s1 + $0x200] sm:$0xff]  ;;  %v118_v36 = vld [vmem:[%s1213_s1 + $0x208] sm:$0xff] }
 0x12d   :  { %468 = vst [vmem:[%s1214_s2 + $0x120] sm:$0xff] %v383_v33  ;;  %v411_v41 = vmul.f32 %v300_v39, %v117_v35  ;;  %v412_v42 = vmul.f32 %v300_v39, %v118_v36  ;;  %v310_v35 = vpop.permute.xlu1 %309  ;;  %v305_v36 = vpop.permute.xlu0 %304 }
 0x134   :  { %v97_v37 = vld [vmem:[%s1213_s1 + $0x160] sm:$0xff]  ;;  %v98_v38 = vld [vmem:[%s1213_s1 + $0x168] sm:$0xff] }
 0x135   :  { %469 = vst.msk [vmem:[%s1214_s2 + $0x128] sm:$0xff] %vm432_vm0, %v384_v34  ;;  %v391_v46 = vmul.f32 %v250_v43, %v97_v37  ;;  %v392_v47 = vmul.f32 %v250_v43, %v98_v38 }
 0x13c   :  { %v95_v40 = vld [vmem:[%s1213_s1 + $0x150] sm:$0xff]  ;;  %v96_v44 = vld [vmem:[%s1213_s1 + $0x158] sm:$0xff] }
 0x13d   :  { %496 = vst [vmem:[%s1214_s2 + $0x200] sm:$0xff] %v411_v41  ;;  %v389_v48 = vmul.f32 %v245_v45, %v95_v40  ;;  %v390_v49 = vmul.f32 %v245_v45, %v96_v44  ;;  %v325_v45 = vpop.permute.xlu1 %324 }
 0x13e   :  { %497 = vst.msk [vmem:[%s1214_s2 + $0x208] sm:$0xff] %vm432_vm0, %v412_v42 }
 0x13f   :  { %476 = vst [vmem:[%s1214_s2 + $0x160] sm:$0xff] %v391_v46  ;;  %v320_v46 = vpop.permute.xlu0 %319 }
 0x140   :  { %477 = vst.msk [vmem:[%s1214_s2 + $0x168] sm:$0xff] %vm432_vm0, %v392_v47 }
 0x147   :  { %v123_v50 = vld [vmem:[%s1213_s1 + $0x230] sm:$0xff]  ;;  %v124_v51 = vld [vmem:[%s1213_s1 + $0x238] sm:$0xff] }
 0x148   :  { %474 = vst [vmem:[%s1214_s2 + $0x150] sm:$0xff] %v389_v48  ;;  %v417_v56 = vmul.f32 %v315_v54, %v123_v50  ;;  %v418_v57 = vmul.f32 %v315_v54, %v124_v51 }
 0x14f   :  { %v103_v52 = vld [vmem:[%s1213_s1 + $0x190] sm:$0xff]  ;;  %v104_v53 = vld [vmem:[%s1213_s1 + $0x198] sm:$0xff] }
 0x150   :  { %475 = vst.msk [vmem:[%s1214_s2 + $0x158] sm:$0xff] %vm432_vm0, %v390_v49  ;;  %v397_v61 = vmul.f32 %v265_v58, %v103_v52  ;;  %v398_v62 = vmul.f32 %v265_v58, %v104_v53 }
 0x157   :  { %v101_v55 = vld [vmem:[%s1213_s1 + $0x180] sm:$0xff]  ;;  %v102_v59 = vld [vmem:[%s1213_s1 + $0x188] sm:$0xff] }
 0x158   :  { %502 = vst [vmem:[%s1214_s2 + $0x230] sm:$0xff] %v417_v56  ;;  %v395_v63 = vmul.f32 %v260_v60, %v101_v55  ;;  %v396_v0 = vmul.f32 %v260_v60, %v102_v59  ;;  %v340_v55 = vpop.permute.xlu1 %339  ;;  %v335_v56 = vpop.permute.xlu0 %334 }
 0x159   :  { %503 = vst.msk [vmem:[%s1214_s2 + $0x238] sm:$0xff] %vm432_vm0, %v418_v57 }
 0x15a   :  { %482 = vst [vmem:[%s1214_s2 + $0x190] sm:$0xff] %v397_v61 }
 0x15b   :  { %483 = vst.msk [vmem:[%s1214_s2 + $0x198] sm:$0xff] %vm432_vm0, %v398_v62 }
 0x162   :  { %v129_v1 = vld [vmem:[%s1213_s1 + $0x260] sm:$0xff]  ;;  %v130_v2 = vld [vmem:[%s1213_s1 + $0x268] sm:$0xff] }
 0x163   :  { %480 = vst [vmem:[%s1214_s2 + $0x180] sm:$0xff] %v395_v63  ;;  %v423_v7 = vmul.f32 %v330_v5, %v129_v1  ;;  %v424_v8 = vmul.f32 %v330_v5, %v130_v2 }
 0x16a   :  { %v109_v3 = vld [vmem:[%s1213_s1 + $0x1c0] sm:$0xff]  ;;  %v110_v4 = vld [vmem:[%s1213_s1 + $0x1c8] sm:$0xff] }
 0x16b   :  { %481 = vst.msk [vmem:[%s1214_s2 + $0x188] sm:$0xff] %vm432_vm0, %v396_v0  ;;  %v403_v12 = vmul.f32 %v280_v9, %v109_v3  ;;  %v404_v13 = vmul.f32 %v280_v9, %v110_v4 }
 0x172   :  { %v107_v6 = vld [vmem:[%s1213_s1 + $0x1b0] sm:$0xff]  ;;  %v108_v10 = vld [vmem:[%s1213_s1 + $0x1b8] sm:$0xff] }
 0x173   :  { %508 = vst [vmem:[%s1214_s2 + $0x260] sm:$0xff] %v423_v7  ;;  %v401_v14 = vmul.f32 %v275_v11, %v107_v6  ;;  %v402_v15 = vmul.f32 %v275_v11, %v108_v10 }
 0x174   :  { %509 = vst.msk [vmem:[%s1214_s2 + $0x268] sm:$0xff] %vm432_vm0, %v424_v8 }
 0x175   :  { %488 = vst [vmem:[%s1214_s2 + $0x1c0] sm:$0xff] %v403_v12 }
 0x176   :  { %489 = vst.msk [vmem:[%s1214_s2 + $0x1c8] sm:$0xff] %vm432_vm0, %v404_v13 }
 0x17d   :  { %v135_v16 = vld [vmem:[%s1213_s1 + $0x290] sm:$0xff]  ;;  %v136_v17 = vld [vmem:[%s1213_s1 + $0x298] sm:$0xff] }
 0x17e   :  { %486 = vst [vmem:[%s1214_s2 + $0x1b0] sm:$0xff] %v401_v14  ;;  %v429_v22 = vmul.f32 %v345_v20, %v135_v16  ;;  %v430_v23 = vmul.f32 %v345_v20, %v136_v17 }
 0x185   :  { %v115_v18 = vld [vmem:[%s1213_s1 + $0x1f0] sm:$0xff]  ;;  %v116_v19 = vld [vmem:[%s1213_s1 + $0x1f8] sm:$0xff] }
 0x186   :  { %487 = vst.msk [vmem:[%s1214_s2 + $0x1b8] sm:$0xff] %vm432_vm0, %v402_v15  ;;  %v409_v27 = vmul.f32 %v295_v24, %v115_v18  ;;  %v410_v28 = vmul.f32 %v295_v24, %v116_v19 }
 0x18d   :  { %v113_v21 = vld [vmem:[%s1213_s1 + $0x1e0] sm:$0xff]  ;;  %v114_v25 = vld [vmem:[%s1213_s1 + $0x1e8] sm:$0xff] }
 0x18e   :  { %514 = vst [vmem:[%s1214_s2 + $0x290] sm:$0xff] %v429_v22  ;;  %v407_v29 = vmul.f32 %v290_v26, %v113_v21  ;;  %v408_v30 = vmul.f32 %v290_v26, %v114_v25 }
 0x18f   :  { %515 = vst.msk [vmem:[%s1214_s2 + $0x298] sm:$0xff] %vm432_vm0, %v430_v23 }
 0x190   :  { %494 = vst [vmem:[%s1214_s2 + $0x1f0] sm:$0xff] %v409_v27 }
 0x191   :  { %495 = vst.msk [vmem:[%s1214_s2 + $0x1f8] sm:$0xff] %vm432_vm0, %v410_v28 }
 0x192   :  { %492 = vst [vmem:[%s1214_s2 + $0x1e0] sm:$0xff] %v407_v29 }
 0x199   :  { %v121_v31 = vld [vmem:[%s1213_s1 + $0x220] sm:$0xff]  ;;  %v122_v32 = vld [vmem:[%s1213_s1 + $0x228] sm:$0xff]  ;;  %v119_v33 = vld [vmem:[%s1213_s1 + $0x210] sm:$0xff] }
 0x19a   :  { %493 = vst.msk [vmem:[%s1214_s2 + $0x1e8] sm:$0xff] %vm432_vm0, %v408_v30  ;;  %v415_v37 = vmul.f32 %v310_v35, %v121_v31  ;;  %v416_v38 = vmul.f32 %v310_v35, %v122_v32  ;;  %v413_v39 = vmul.f32 %v305_v36, %v119_v33 }
 0x1a1   :  { %v120_v34 = vld [vmem:[%s1213_s1 + $0x218] sm:$0xff] }
 0x1a2   :  { %v414_v40 = vmul.f32 %v305_v36, %v120_v34  ;;  %500 = vst [vmem:[%s1214_s2 + $0x220] sm:$0xff] %v415_v37 }
 0x1a3   :  { %501 = vst.msk [vmem:[%s1214_s2 + $0x228] sm:$0xff] %vm432_vm0, %v416_v38 }
 0x1a4   :  { %498 = vst [vmem:[%s1214_s2 + $0x210] sm:$0xff] %v413_v39 }
 0x1a5   :  { %499 = vst.msk [vmem:[%s1214_s2 + $0x218] sm:$0xff] %vm432_vm0, %v414_v40 }
 0x1ac   :  { %v127_v41 = vld [vmem:[%s1213_s1 + $0x250] sm:$0xff]  ;;  %v128_v42 = vld [vmem:[%s1213_s1 + $0x258] sm:$0xff]  ;;  %v125_v43 = vld [vmem:[%s1213_s1 + $0x240] sm:$0xff] }
 0x1ad   :  { %v126_v44 = vld [vmem:[%s1213_s1 + $0x248] sm:$0xff]  ;;  %v421_v47 = vmul.f32 %v325_v45, %v127_v41  ;;  %v422_v48 = vmul.f32 %v325_v45, %v128_v42  ;;  %v419_v49 = vmul.f32 %v320_v46, %v125_v43 }
 0x1ae   :  { %v420_v50 = vmul.f32 %v320_v46, %v126_v44 }
 0x1af   :  { %506 = vst [vmem:[%s1214_s2 + $0x250] sm:$0xff] %v421_v47 }
 0x1b0   :  { %507 = vst.msk [vmem:[%s1214_s2 + $0x258] sm:$0xff] %vm432_vm0, %v422_v48 }
 0x1b1   :  { %504 = vst [vmem:[%s1214_s2 + $0x240] sm:$0xff] %v419_v49 }
 0x1b2   :  { %505 = vst.msk [vmem:[%s1214_s2 + $0x248] sm:$0xff] %vm432_vm0, %v420_v50 }
 0x1b9   :  { %v133_v51 = vld [vmem:[%s1213_s1 + $0x280] sm:$0xff]  ;;  %v134_v52 = vld [vmem:[%s1213_s1 + $0x288] sm:$0xff]  ;;  %v131_v53 = vld [vmem:[%s1213_s1 + $0x270] sm:$0xff] }
 0x1ba   :  { %v132_v54 = vld [vmem:[%s1213_s1 + $0x278] sm:$0xff]  ;;  %v427_v57 = vmul.f32 %v340_v55, %v133_v51  ;;  %v428_v58 = vmul.f32 %v340_v55, %v134_v52  ;;  %v425_v59 = vmul.f32 %v335_v56, %v131_v53 }
 0x1bb   :  { %v426_v60 = vmul.f32 %v335_v56, %v132_v54 }
 0x1bc   :  { %512 = vst [vmem:[%s1214_s2 + $0x280] sm:$0xff] %v427_v57 }
 0x1bd   :  { %513 = vst.msk [vmem:[%s1214_s2 + $0x288] sm:$0xff] %vm432_vm0, %v428_v58 }
 0x1be   :  { %510 = vst [vmem:[%s1214_s2 + $0x270] sm:$0xff] %v425_v59 }
 0x1bf   :  { %511 = vst.msk [vmem:[%s1214_s2 + $0x278] sm:$0xff] %vm432_vm0, %v426_v60 }

</bundles_post_ra>
